<compile_context>
chip_gen: v6e
topology: v6e:2x2x1
jax: 0.10.0
libtpu: 0.0.40
codegen_flags: <defaults>
</compile_context>

<pallas_src>
import functools

import jax
import jax.numpy as jnp
import numpy as np
from jax.experimental import pallas as pl
from jax.experimental.pallas import tpu as pltpu


# ----------------------------- helpers ------------------------------------ #

def _l2norm(x, axis=-1):
    # matches F.normalize(x, p=2, dim=axis): x / max(||x||, eps), eps=1e-12,
    # written with rsqrt so the sqrt+div goes to the EUP slot.
    ss = jnp.sum(x * x, axis=axis, keepdims=True)
    return x * jax.lax.rsqrt(jnp.maximum(ss, 1e-24))


def _l2norm_ref(x, axis=-1, eps=1e-12):
    n = jnp.sqrt(jnp.sum(x * x, axis=axis, keepdims=True))
    return x / jnp.maximum(n, eps)


def _norm_rows(w):   # L2Norm(dim=-1) on weight
    return w / jnp.maximum(jnp.sqrt(jnp.sum(w * w, axis=-1, keepdims=True)), 1e-12)


def _norm_cols(w):   # L2Norm(dim=0) on weight
    return w / jnp.maximum(jnp.sqrt(jnp.sum(w * w, axis=0, keepdims=True)), 1e-12)


def patchify(x, p):
    # 'b c (h p1) (w p2) -> b (h w) (c p1 p2)'
    B, C, H, W = x.shape
    h, w = H // p, W // p
    x = x.reshape(B, C, h, p, w, p)
    x = jnp.transpose(x, (0, 2, 4, 1, 3, 5))          # b h w c p1 p2
    return x.reshape(B, h * w, C * p * p)


# ----------------------------- kernels ------------------------------------ #

def patch_embed_kernel(patches_ref, w_ref, pos_ref, out_ref):
    # patches: [M, PD] f32, w: [PD, D] bf16 (pre-transposed, col-normalized),
    # pos: [M, D] f32 (pos emb tiled over batch).
    p = patches_ref[...].astype(jnp.bfloat16)
    tok = jnp.dot(p, w_ref[...], preferred_element_type=jnp.float32)   # [M, D]
    tok = tok + pos_ref[...]
    out_ref[...] = _l2norm(tok)


def nvit_layer_kernel(tokens_ref,
                      wq_ref, wk_ref, wv_ref, woa_ref, qs_ref, ks_ref, aa_ref,
                      wh_ref, wg_ref, wof_ref, hs_ref, gs_ref, fa_ref,
                      out_ref, tok_sc,
                      *, batch, seq, heads, dim_head, dim_sqrt):
    """One transformer layer per grid step; tokens stay resident in VMEM scratch."""
    layer = pl.program_id(0)

    @pl.when(layer == 0)
    def _():
        tok_sc[...] = tokens_ref[...]

    x = tok_sc[...]                                   # [M, D] f32 (M = batch*seq)
    xb = x.astype(jnp.bfloat16)

    # ---------------- attention block ----------------
    q = jnp.dot(xb, wq_ref[0], preferred_element_type=jnp.float32)     # [M, DI]
    k = jnp.dot(xb, wk_ref[0], preferred_element_type=jnp.float32)
    v = jnp.dot(xb, wv_ref[0], preferred_element_type=jnp.float32)

    di = heads * dim_head
    q3 = q.reshape(batch, seq, di)
    k3 = k.reshape(batch, seq, di)
    v3 = v.reshape(batch, seq, di)
    qscale = qs_ref[0]                                # [1, DI]
    kscale = ks_ref[0]

    head_outs = []
    for h in range(heads):                            # static unroll (heads is small)
        sl = slice(h * dim_head, (h + 1) * dim_head)
        qh = _l2norm(q3[:, :, sl]) * qscale[:, sl]    # [B, N, dh]
        kh = _l2norm(k3[:, :, sl]) * kscale[:, sl]
        vh = v3[:, :, sl]
        s = jnp.einsum('bnd,bmd->bnm', qh, kh,
                       preferred_element_type=jnp.float32)             # scale = 1.0
        s = s - jnp.max(s, axis=-1, keepdims=True)
        p = jnp.exp(s)
        p = p * pl.reciprocal(jnp.sum(p, axis=-1, keepdims=True), approx=True)
        head_outs.append(jnp.einsum('bnm,bmd->bnd', p, vh,
                                    preferred_element_type=jnp.float32))

    o = jnp.concatenate(head_outs, axis=-1).reshape(batch * seq, di)    # [M, DI]
    attn_out = jnp.dot(o.astype(jnp.bfloat16), woa_ref[0],
                       preferred_element_type=jnp.float32)              # [M, D]
    attn_out = _l2norm(attn_out)
    x = _l2norm(x + aa_ref[0] * (attn_out - x))       # lerp(x, attn_out, alpha)

    # ---------------- feed-forward block ----------------
    xb = x.astype(jnp.bfloat16)
    hidden = jnp.dot(xb, wh_ref[0], preferred_element_type=jnp.float32) * hs_ref[0]
    gate = jnp.dot(xb, wg_ref[0], preferred_element_type=jnp.float32) * (gs_ref[0] * dim_sqrt)
    hidden = (gate * jax.nn.sigmoid(gate)) * hidden   # silu(gate) * hidden
    ff_out = jnp.dot(hidden.astype(jnp.bfloat16), wof_ref[0],
                     preferred_element_type=jnp.float32)                # [M, D]
    ff_out = _l2norm(ff_out)
    x = _l2norm(x + fa_ref[0] * (ff_out - x))

    tok_sc[...] = x

    @pl.when(layer == pl.num_programs(0) - 1)
    def _():
        out_ref[...] = x


# --------------------------- pallas wrappers ------------------------------- #

def patch_embed_pallas(patches_flat, w_embed_t, pos_tiled):
    M, _ = patches_flat.shape
    D = w_embed_t.shape[1]
    # Single invocation, whole arrays in VMEM (tiny).
    return pl.pallas_call(
        patch_embed_kernel,
        out_shape=jax.ShapeDtypeStruct((M, D), jnp.float32),
    )(patches_flat, w_embed_t, pos_tiled)


def nvit_layers_pallas(tokens_flat, kp, *, batch, seq, heads, dim_head, dim_sqrt):
    M, D = tokens_flat.shape
    depth = kp["wq_t"].shape[0]
    DI = kp["wq_t"].shape[2]
    DIF = kp["wh_t"].shape[2]

    kern = functools.partial(nvit_layer_kernel, batch=batch, seq=seq,
                             heads=heads, dim_head=dim_head, dim_sqrt=dim_sqrt)

    def resident(shape):          # same block every step -> fetched once / resident
        return pl.BlockSpec(shape, lambda l: (0, 0))

    def per_layer(shape):         # stacked [depth, ...]; layer l's slice per step
        return pl.BlockSpec((1,) + shape, lambda l: (l, 0, 0))

    return pl.pallas_call(
        kern,
        out_shape=jax.ShapeDtypeStruct((M, D), jnp.float32),
        grid_spec=pltpu.PrefetchScalarGridSpec(
            num_scalar_prefetch=0,
            grid=(depth,),
            in_specs=[
                resident((M, D)),       # tokens (read at layer 0 only)
                per_layer((D, DI)),     # wq^T (bf16)
                per_layer((D, DI)),     # wk^T
                per_layer((D, DI)),     # wv^T
                per_layer((DI, D)),     # wo_attn^T
                per_layer((1, DI)),     # q_scale (flattened over heads)
                per_layer((1, DI)),     # k_scale
                per_layer((1, D)),      # attn_alpha * sqrt(D)
                per_layer((D, DIF)),    # wh^T
                per_layer((D, DIF)),    # wg^T
                per_layer((DIF, D)),    # wo_ff^T
                per_layer((1, DIF)),    # hidden_scale
                per_layer((1, DIF)),    # gate_scale
                per_layer((1, D)),      # ff_alpha * sqrt(D)
            ],
            out_specs=pl.BlockSpec((M, D), lambda l: (0, 0)),
            scratch_shapes=[pltpu.VMEM((M, D), jnp.float32)],   # resident token carry
        ),
        compiler_params=pltpu.CompilerParams(dimension_semantics=("arbitrary",)),
    )(tokens_flat,
      kp["wq_t"], kp["wk_t"], kp["wv_t"], kp["wo_attn_t"],
      kp["q_scale"], kp["k_scale"], kp["attn_alpha"],
      kp["wh_t"], kp["wg_t"], kp["wo_ff_t"],
      kp["hidden_scale"], kp["gate_scale"], kp["ff_alpha"])


# ----------------------------- model glue ---------------------------------- #

def init_nvit_params(key, *, image_size, patch_size, channels, dim, depth,
                     heads, dim_head, mlp_dim):
    num_patches = (image_size // patch_size) ** 2
    patch_dim = channels * patch_size ** 2
    dim_inner = heads * dim_head
    ff_inner = int(mlp_dim * 2 / 3)
    scale = dim ** 0.5
    lerp_init = (1.0 / depth) / scale

    # FIX: 2 global + 7 random weights per layer (previous version split too few keys).
    keys = jax.random.split(key, 2 + depth * 7)
    kit = iter(keys)

    def rand(shape):
        return 0.02 * jax.random.normal(next(kit), shape, dtype=jnp.float32)

    params = {
        # NormLinear(patch_dim, dim, norm_dim_in=False): weight [dim, patch_dim], norm dim=0
        "w_embed": _norm_cols(rand((dim, patch_dim))),
        # abs_pos_emb = NormLinear(dim, num_patches): weight [num_patches, dim], norm dim=-1
        "pos_emb": _norm_rows(rand((num_patches, dim))),
        "layers": [],
    }
    for _ in range(depth):
        layer = {
            "wq": _norm_rows(rand((dim_inner, dim))),
            "wk": _norm_rows(rand((dim_inner, dim))),
            "wv": _norm_rows(rand((dim_inner, dim))),
            "wo_attn": _norm_cols(rand((dim, dim_inner))),            # norm_dim_in=False
            "q_scale": jnp.full((heads, dim_head), dim_head ** 0.25, jnp.float32),
            "k_scale": jnp.full((heads, dim_head), dim_head ** 0.25, jnp.float32),
            "wh": _norm_rows(rand((ff_inner, dim))),
            "wg": _norm_rows(rand((ff_inner, dim))),
            "wo_ff": _norm_cols(rand((dim, ff_inner))),               # norm_dim_in=False
            "hidden_scale": jnp.ones((1, ff_inner), jnp.float32),
            "gate_scale": jnp.ones((1, ff_inner), jnp.float32),
            "attn_alpha": jnp.full((1, dim), lerp_init, jnp.float32),
            "ff_alpha": jnp.full((1, dim), lerp_init, jnp.float32),
        }
        params["layers"].append(layer)
    return params


def prepare_kernel_params(params, *, dim, heads, dim_head):
    """Pre-transpose to [in, out], cast matmul weights to bf16, stack per-layer tensors."""
    scale = dim ** 0.5
    layers = params["layers"]
    depth = len(layers)
    stack = lambda name: jnp.stack([l[name] for l in layers], axis=0)
    t_bf16 = lambda w: jnp.transpose(w, (0, 2, 1)).astype(jnp.bfloat16)

    return {
        "w_embed_t": params["w_embed"].T.astype(jnp.bfloat16),          # [PD, D]
        "pos_emb": params["pos_emb"].astype(jnp.float32),               # [N, D]
        "wq_t": t_bf16(stack("wq")),                                    # [depth, D, DI]
        "wk_t": t_bf16(stack("wk")),
        "wv_t": t_bf16(stack("wv")),
        "wo_attn_t": t_bf16(stack("wo_attn")),                          # [depth, DI, D]
        "q_scale": stack("q_scale").reshape(depth, 1, heads * dim_head),
        "k_scale": stack("k_scale").reshape(depth, 1, heads * dim_head),
        "attn_alpha": stack("attn_alpha") * scale,                      # [depth, 1, D]
        "wh_t": t_bf16(stack("wh")),                                    # [depth, D, DIF]
        "wg_t": t_bf16(stack("wg")),
        "wo_ff_t": t_bf16(stack("wo_ff")),                              # [depth, DIF, D]
        "hidden_scale": stack("hidden_scale"),                          # [depth, 1, DIF]
        "gate_scale": stack("gate_scale"),
        "ff_alpha": stack("ff_alpha") * scale,
    }


def nvit_forward_pallas(params, x, *, patch_size, dim, heads, dim_head):
    kp = prepare_kernel_params(params, dim=dim, heads=heads, dim_head=dim_head)
    patches = patchify(x, patch_size).astype(jnp.float32)       # [B, N, PD]
    B, N, PD = patches.shape
    M = B * N
    patches_flat = patches.reshape(M, PD)
    pos_tiled = jnp.tile(kp["pos_emb"], (B, 1))                 # [M, D]
    tokens = patch_embed_pallas(patches_flat, kp["w_embed_t"], pos_tiled)   # [M, D]
    tokens = nvit_layers_pallas(tokens, kp, batch=B, seq=N, heads=heads,
                                dim_head=dim_head, dim_sqrt=dim ** 0.5)
    return tokens.reshape(B, N, dim)


def nvit_forward_reference(params, x, *, patch_size, dim, heads, dim_head):
    # pure-JAX f32 reference mirroring the PyTorch forward exactly
    scale = dim ** 0.5
    tokens = patchify(x, patch_size) @ params["w_embed"].T
    tokens = _l2norm_ref(tokens + params["pos_emb"][None])
    B, N, _ = tokens.shape
    for layer in params["layers"]:
        x0 = tokens
        q = x0 @ layer["wq"].T
        k = x0 @ layer["wk"].T
        v = x0 @ layer["wv"].T
        split = lambda t: t.reshape(B, N, heads, dim_head).transpose(0, 2, 1, 3)
        qh, kh, vh = split(q), split(k), split(v)
        qh = _l2norm_ref(qh) * layer["q_scale"][None, :, None, :]
        kh = _l2norm_ref(kh) * layer["k_scale"][None, :, None, :]
        scores = jnp.einsum("bhnd,bhmd->bhnm", qh, kh)
        p = jax.nn.softmax(scores, axis=-1)
        o = jnp.einsum("bhnm,bhmd->bhnd", p, vh)
        o = o.transpose(0, 2, 1, 3).reshape(B, N, heads * dim_head)
        attn_out = _l2norm_ref(o @ layer["wo_attn"].T)
        alpha = layer["attn_alpha"] * scale
        tokens = _l2norm_ref(x0 + alpha * (attn_out - x0))
        x1 = tokens
        hidden = (x1 @ layer["wh"].T) * layer["hidden_scale"]
        gate = (x1 @ layer["wg"].T) * layer["gate_scale"] * scale
        hidden = jax.nn.silu(gate) * hidden
        ff_out = _l2norm_ref(hidden @ layer["wo_ff"].T)
        alpha = layer["ff_alpha"] * scale
        tokens = _l2norm_ref(x1 + alpha * (ff_out - x1))
    return tokens


# ------------------------------- main --------------------------------------- #

if __name__ == "__main__":
    # small config consistent with nViT constructor
    IMAGE_SIZE = 16
    PATCH_SIZE = 4
    CHANNELS = 3
    DIM = 64
    DEPTH = 2
    HEADS = 2
    DIM_HEAD = 32
    MLP_DIM = 96
    BATCH = 2

    key = jax.random.PRNGKey(0)
    k_params, k_x = jax.random.split(key)
    params = init_nvit_params(
        k_params, image_size=IMAGE_SIZE, patch_size=PATCH_SIZE, channels=CHANNELS,
        dim=DIM, depth=DEPTH, heads=HEADS, dim_head=DIM_HEAD, mlp_dim=MLP_DIM)

    x = jax.random.normal(k_x, (BATCH, CHANNELS, IMAGE_SIZE, IMAGE_SIZE), dtype=jnp.float32)

    out = nvit_forward_pallas(params, x, patch_size=PATCH_SIZE, dim=DIM,
                              heads=HEADS, dim_head=DIM_HEAD)
    out = jax.block_until_ready(out)

    ref = nvit_forward_reference(params, x, patch_size=PATCH_SIZE, dim=DIM,
                                 heads=HEADS, dim_head=DIM_HEAD)
    ref = jax.block_until_ready(ref)

    assert out.shape == (BATCH, (IMAGE_SIZE // PATCH_SIZE) ** 2, DIM)
    np.testing.assert_allclose(np.asarray(out), np.asarray(ref), rtol=5e-2, atol=5e-2)
    print("KERNEL_OK")
</pallas_src>

<mosaic_0001>
module attributes {stable_mosaic.version = 11 : i64} {
  func.func @patch_embed_kernel(%arg0: memref<32x48xf32, #tpu.memory_space<vmem>>, %arg1: memref<48x64xbf16, #tpu.memory_space<vmem>>, %arg2: memref<32x64xf32, #tpu.memory_space<vmem>>, %arg3: memref<32x64xf32, #tpu.memory_space<vmem>>) attributes {dimension_semantics = [], scalar_prefetch = 0 : i64, scratch_operands = 0 : i64, tpu.core_type = #tpu.core_type<tc>} {
    %c0 = arith.constant 0 : index
    %c0_0 = arith.constant 0 : index
    %0 = vector.load %arg0[%c0, %c0_0] : memref<32x48xf32, #tpu.memory_space<vmem>>, vector<32x48xf32>
    %1 = arith.truncf %0 : vector<32x48xf32> to vector<32x48xbf16>
    %c0_1 = arith.constant 0 : index
    %c0_2 = arith.constant 0 : index
    %2 = vector.load %arg1[%c0_1, %c0_2] : memref<48x64xbf16, #tpu.memory_space<vmem>>, vector<48x64xbf16>
    %cst = arith.constant dense<0.000000e+00> : vector<32x64xf32>
    %3 = tpu.matmul %1, %2, %cst {dimension_numbers = #tpu.dot_dimension_numbers<[1], [0], [0], [1], [0, 0, 1, 1], [], []>} : vector<32x48xbf16>, vector<48x64xbf16>, vector<32x64xf32> -> vector<32x64xf32>
    %c0_3 = arith.constant 0 : index
    %c0_4 = arith.constant 0 : index
    %4 = vector.load %arg2[%c0_3, %c0_4] : memref<32x64xf32, #tpu.memory_space<vmem>>, vector<32x64xf32>
    %5 = arith.addf %3, %4 : vector<32x64xf32>
    %6 = arith.mulf %5, %5 : vector<32x64xf32>
    %cst_5 = arith.constant dense<0.000000e+00> : vector<32xf32>
    %7 = vector.multi_reduction <add>, %6, %cst_5 [1] : vector<32x64xf32> to vector<32xf32>
    %8 = vector.shape_cast %7 : vector<32xf32> to vector<32x1xf32>
    %cst_6 = arith.constant 1.000000e-24 : f32
    %9 = vector.broadcast %cst_6 : f32 to vector<32x1xf32>
    %10 = arith.maximumf %8, %9 : vector<32x1xf32>
    %11 = math.rsqrt %10 : vector<32x1xf32>
    %12 = vector.broadcast %11 : vector<32x1xf32> to vector<32x64xf32>
    %13 = arith.mulf %5, %12 : vector<32x64xf32>
    %c0_7 = arith.constant 0 : index
    %c0_8 = arith.constant 0 : index
    %14 = vector.load %arg3[%c0_7, %c0_8] : memref<32x64xf32, #tpu.memory_space<vmem>>, vector<32x64xf32>
    tpu.vector_store %arg3[%c0_7, %c0_8], %13 {strides = array<i32>} : memref<32x64xf32, #tpu.memory_space<vmem>>, vector<32x64xf32>,
    return
  }
}

</mosaic_0001>

<bundles_post_ra>
// kernel: tpu_custom_call.1
= control target key start
LH: loop header
LB: loop body
LE: loop exit
PB: predicated region body
PF: predicated region fallthrough
CT: control target
= control target key end

     0   :  { %8 = vsyncpa [#allocation3], 0  ;;  %s380_s0 = inlined_call_operand.hbm [shape: f32[32,48], index: 0, kind: input, shape index: {}]   ;;  %s381_s1 = inlined_call_operand.hbm [shape: bf16[48,64], index: 1, kind: input, shape index: {}]   ;;  %s382_s2 = inlined_call_operand.hbm [shape: f32[32,64], index: 2, kind: input, shape index: {}]   ;;  %s383_s3 = inlined_call_operand.hbm [shape: f32[32,64], index: 3, kind: output, shape index: {}]  }
   0x1   :  { %9 = vsyncpa [#allocation6], 0 }
   0x2   :  { %10 = vsyncpa [#allocation4], 0  ;;  %s323_s12 = smov [#allocation5]  }
   0x3   :  { %s28_s13 = sshll.u32 %s323_s12, 4  ;;  %s29_s13 = int_to_ptr.vmem [resolvable:$true] %s28_s13 }
   0x4   :  { %s245_s14 = scalar_lea.vmem %s29_s13, 384  ;;  %p250_p1 = scmp.lt.s32.totalorder %s29_s13, %s29_s13 }
   0x5   :  { %p246_p0 = scmp.ne.s32.totalorder %s29_s13, %s245_s14  ;;  %p251_p2 = scmp.lt.s32.totalorder %s245_s14, %s245_s14 }
   0x7   :  { %p252_p3 = por %p251_p2, %p250_p1 }
   0x9   :  { %p253_p4 = pnand %p252_p3, %p246_p0 }
   0xb   :  { %256 = shalt.err (!%p253_p4)
}
   0xc   :  { %s324_s15 = smov 64   ;;  %s325_s16 = smov 4  }
   0xd   :  { %34 = dma.hbm_to_vmem [thread:$0]  %s381_s1, 384, %s29_s13, [#allocation6], %s324_s15, %s324_s15, %s325_s16  }
   0xe   :  { %s326_s19 = smov [#allocation2]  }
   0xf   :  { %s16_s20 = sshll.u32 %s326_s19, 4  ;;  %s17_s20 = int_to_ptr.vmem [resolvable:$true] %s16_s20 }
  0x10   :  { %s265_s21 = scalar_lea.vmem %s17_s20, 512  ;;  %p270_p6 = scmp.lt.s32.totalorder %s17_s20, %s17_s20 }
  0x11   :  { %p266_p5 = scmp.ne.s32.totalorder %s17_s20, %s265_s21  ;;  %p271_p7 = scmp.lt.s32.totalorder %s265_s21, %s265_s21 }
  0x13   :  { %p272_p8 = por %p271_p7, %p270_p6 }
  0x15   :  { %p273_p9 = pnand %p272_p8, %p266_p5 }
  0x17   :  { %276 = shalt.err (!%p273_p9)
}
  0x18   :  { %s327_s22 = smov 128   ;;  %s328_s23 = smov 8  }
  0x19   :  { %22 = dma.hbm_to_vmem [thread:$0]  %s380_s0, 512, %s17_s20, [#allocation3], %s327_s22, %s327_s22, %s328_s23  }
  0x1a   :  { %s329_s1 = smov [#allocation7]  }
  0x1b   :  { %s40_s26 = sshll.u32 %s329_s1, 4  ;;  %s41_s26 = int_to_ptr.vmem [resolvable:$true] %s40_s26 }
  0x1c   :  { %s285_s27 = scalar_lea.vmem %s41_s26, 512  ;;  %p290_p11 = scmp.lt.s32.totalorder %s41_s26, %s41_s26 }
  0x1d   :  { %p286_p10 = scmp.ne.s32.totalorder %s41_s26, %s285_s27  ;;  %p291_p12 = scmp.lt.s32.totalorder %s285_s27, %s285_s27 }
  0x1f   :  { %p292_p13 = por %p291_p12, %p290_p11 }
  0x21   :  { %p293_p0 = pnand %p292_p13, %p286_p10 }
  0x23   :  { %296 = shalt.err (!%p293_p0)
}
  0x24   :  { %46 = dma.hbm_to_vmem [thread:$0]  %s382_s2, 512, %s41_s26, [#allocation6], %s327_s22, %s327_s22, %s328_s23  }
  0x25   :  { %317 = dma.done.wait [#allocation3], 512  }
  0x26   :  { %318 = vsyncadd [#allocation3], 4294966784 }
  0x27   :  { %319 = dma.done.wait [#allocation6], 896  }
  0x28   :  { %320 = vsyncadd [#allocation6], 4294966400  ;;  %v226_v0 = vld [vmem:[#allocation5 + $0x10] sm:$0xff]   ;;  %v227_v1 = vld [vmem:[#allocation5 + $0x8] sm:$0xff]   ;;  %vm91_vm0 = vcmask 392192   ;;  %vm151_vm1 = vcmask 523264  }
  0x29   :  { %208 = vmatprep.subr.bf16.mxu0 %v226_v0  ;;  %v57_v2 = vld [vmem:[#allocation2] sm:$0xff]  ;;  %v58_v3 = vld [vmem:[#allocation2 + $0x8] sm:$0xff]  ;;  %v59_v6 = vld [vmem:[#allocation2 + $0x10] sm:$0xff]  ;;  %s330_s0 = smov [#allocation8]  }
  0x2a   :  { %209 = vmatpush3.bf16.msra.mxu0 %v226_v0  ;;  %v228_v4 = vld [vmem:[#allocation5] sm:$0xff]   ;;  %v61_v5 = vpack.c.bf16 %v58_v3, %v57_v2  ;;  %v60_v7 = vld [vmem:[#allocation2 + $0x18] sm:$0xff]  ;;  %v71_v9 = vld [vmem:[#allocation7 + $0x10] sm:$0xff]  ;;  %s185_s2 = sshll.u32 %s330_s0, 4  ;;  %s186_s2 = int_to_ptr.vmem [resolvable:$true] %s185_s2 }
  0x2b   :  { %210 = vmatprep.subr.bf16.mxu0 %v227_v1  ;;  %v62_v8 = vpack.c.bf16 %v60_v7, %v59_v6  ;;  %v69_v11 = vld [vmem:[#allocation7] sm:$0xff]  ;;  %v72_v14 = vld [vmem:[#allocation7 + $0x18] sm:$0xff]  ;;  %v70_v18 = vld [vmem:[#allocation7 + $0x8] sm:$0xff]  ;;  %s297_s30 = scalar_lea.vmem %s186_s2, 512  ;;  %p302_p2 = scmp.lt.s32.totalorder %s186_s2, %s186_s2 }
  0x2c   :  { %214 = vmatprep.mubr.msk.bf16.mxu0 %vm91_vm0, %v61_v5  ;;  %p298_p1 = scmp.ne.s32.totalorder %s186_s2, %s297_s30  ;;  %p303_p3 = scmp.lt.s32.totalorder %s297_s30, %s297_s30 }
  0x2e   :  { %211 = vmatpush3.bf16.msra.mxu0 %v227_v1  ;;  %p304_p4 = por %p303_p3, %p302_p2 }
  0x2f   :  { %212 = vmatprep.subr.bf16.mxu0 %v228_v4 }
  0x30   :  { %p305_p5 = pnand %p304_p4, %p298_p1 }
  0x32   :  { %213 = vmatpush3.bf16.msra.mxu0 %v228_v4 }
  0x35   :  { %215 = vmatmul.mubr.msk.bf16.vlgmr.msra.gmra.mxu0 %vm91_vm0, %v62_v8 }
  0xf5   :  { %v216_v10 = vpop.f32.mrf.mxu0 }
  0xf6   :  { %v141_v12 = vadd.f32 %v216_v10, %v71_v9 }
  0xf7   :  { %v132_v13 = vpop.f32.mrf.mxu0 }
  0xf8   :  { %v133_v15 = vadd.f32 %v132_v13, %v69_v11  ;;  %v149_v16 = vmul.f32 %v141_v12, %v141_v12 }
  0xf9   :  { %v217_v17 = vpop.f32.mrf.mxu0 }
  0xfa   :  { %v144_v19 = vadd.f32 %v217_v17, %v72_v14  ;;  %v158_v20 = vsel %vm151_vm1, %v149_v16, 0.0  ;;  %v147_v21 = vmul.f32 %v133_v15, %v133_v15 }
  0xfb   :  { %159 = vadd.xlane.f32.xlu1 %v158_v20  ;;  %v135_v22 = vpop.f32.mrf.mxu0 }
  0xfc   :  { %v136_v23 = vadd.f32 %v135_v22, %v70_v18  ;;  %v152_v24 = vsel %vm151_vm1, %v147_v21, 0.0  ;;  %v150_v25 = vmul.f32 %v144_v19, %v144_v19 }
  0xfd   :  { %153 = vadd.xlane.f32.xlu0 %v152_v24 }
  0xfe   :  { %v161_v26 = vsel %vm151_vm1, %v150_v25, 0.0  ;;  %v148_v27 = vmul.f32 %v136_v23, %v136_v23 }
  0xff   :  { %162 = vadd.xlane.f32.xlu1 %v161_v26 }
 0x100   :  { %v155_v28 = vsel %vm151_vm1, %v148_v27, 0.0 }
 0x101   :  { %156 = vadd.xlane.f32.xlu0 %v155_v28 }
 0x184   :  { %v160_v29 = vpop.xlane.xlu1 %159 }
 0x185   :  { %v166_v30 = vmax.f32 %v160_v29, 1e-24 }
 0x186   :  { %v154_v31 = vpop.xlane.xlu0 %153 }
 0x187   :  { %229 = vrsqrt.f32 %v166_v30  ;;  %v164_v32 = vmax.f32 %v154_v31, 1e-24 }
 0x188   :  { %v163_v33 = vpop.xlane.xlu1 %162 }
 0x189   :  { %231 = vrsqrt.f32 %v164_v32  ;;  %v167_v34 = vmax.f32 %v163_v33, 1e-24 }
 0x18a   :  { %v157_v35 = vpop.xlane.xlu0 %156 }
 0x18b   :  { %233 = vrsqrt.f32 %v167_v34  ;;  %v165_v36 = vmax.f32 %v157_v35, 1e-24 }
 0x18d   :  { %235 = vrsqrt.f32 %v165_v36 }
 0x194   :  { %v230_v37 = vpop.eup %229 }
 0x195   :  { %v174_v38 = vmul.f32 %v230_v37, %v141_v12 }
 0x196   :  { %v232_v39 = vpop.eup %231 }
 0x197   :  { %v172_v40 = vmul.f32 %v232_v39, %v133_v15  ;;  %178 = vst.msk [vmem:[#allocation8 + $0x10] sm:$0xff] %vm151_vm1, %v174_v38 }
 0x198   :  { %v234_v41 = vpop.eup %233 }
 0x199   :  { %v175_v42 = vmul.f32 %v234_v41, %v144_v19  ;;  %176 = vst.msk [vmem:[#allocation8] sm:$0xff] %vm151_vm1, %v172_v40 }
 0x19a   :  { %v236_v43 = vpop.eup %235 }
 0x19b   :  { %v173_v44 = vmul.f32 %v236_v43, %v136_v23  ;;  %179 = vst.msk [vmem:[#allocation8 + $0x18] sm:$0xff] %vm151_vm1, %v175_v42 }
 0x19d   :  { %177 = vst.msk [vmem:[#allocation8 + $0x8] sm:$0xff] %vm151_vm1, %v173_v44 }
 0x19e   :  { %308 = shalt.err (!%p305_p5)
}
 0x19f   :  { %191 = dma.vmem_to_hbm [thread:$0]  %s186_s2, 512, %s383_s3, [#allocation4], %s327_s22, %s327_s22, %s328_s23  }
 0x1a0   :  { %321 = dma.done.wait [#allocation4], 512  }
 0x1a1   :  { %322 = vsyncadd [#allocation4], 4294966784 }
 0x1a2   :  { %195 = vsyncpa [#allocation3], 1 }
 0x1a3   :  { %196 = vsyncpa [#allocation6], 1 }
 0x1a4   :  { %197 = vsyncpa [#allocation4], 1 }

</bundles_post_ra>
